<compile_context>
chip_gen: v6e
topology: v6e:2x2x1
jax: 0.10.0
libtpu: 0.0.40
codegen_flags: <defaults>
</compile_context>

<pallas_src>
import functools

import jax
import jax.numpy as jnp
from jax import lax
from jax.experimental import pallas as pl
from jax.experimental.pallas import tpu as pltpu


def _round_up(x, m):
    return ((x + m - 1) // m) * m


def _conv_block_kernel(x_ref, w_ref, b_ref, g_ref, beta_ref, o_ref, *, n_valid_ch):
    # x_ref:    (1, TM, CK)       bf16 im2col patch tile (time-major rows)
    # w_ref:    (CK, C_out_p)     bf16 weights, (k, c_in)-major rows, zero-padded chans
    # b_ref, g_ref, beta_ref: (1, C_out_p) f32
    # o_ref:    (1, C_out_p, TM)  f32 (channel-major, as the module returns)
    y = jnp.dot(x_ref[0, :, :], w_ref[...], preferred_element_type=jnp.float32)
    y = y + b_ref[...]

    # LayerNorm over the channel dimension, eps = 1e-5 (PyTorch default).
    # When channels are lane-padded, mask the statistics to the valid count.
    if n_valid_ch == y.shape[-1]:
        mean = jnp.mean(y, axis=-1, keepdims=True)
        var = jnp.mean(jnp.square(y - mean), axis=-1, keepdims=True)
    else:
        ch = lax.broadcasted_iota(jnp.int32, y.shape, 1)
        mask = (ch < n_valid_ch).astype(jnp.float32)
        inv_n = jnp.float32(1.0 / n_valid_ch)
        mean = jnp.sum(y * mask, axis=-1, keepdims=True) * inv_n
        var = jnp.sum(jnp.square(y - mean) * mask, axis=-1, keepdims=True) * inv_n
    y = (y - mean) * lax.rsqrt(var + jnp.float32(1e-5))
    y = y * g_ref[...] + beta_ref[...]

    # Exact (erf-based) GELU, matching torch.nn.functional.gelu default.
    y = 0.5 * y * (1.0 + lax.erf(y * jnp.float32(0.7071067811865476)))

    # In-kernel transpose (XLU) -> channel-major store; avoids a separate
    # HBM transpose pass over the output.
    o_ref[0, :, :] = jnp.transpose(y).astype(o_ref.dtype)


@functools.partial(jax.jit, static_argnames=("kernel_size", "stride"))
def conv_layer_block(x, length, weight, bias, ln_gamma, ln_beta, *, kernel_size, stride):
    """Forward pass of ConvLayerBlock.

    Args:
        x:      [batch, in_channels, in_frames] float32
        length: [batch] int32 or None
        weight: [out_channels, in_channels, kernel_size]
        bias:   [out_channels]
        ln_gamma, ln_beta: [out_channels]  (LayerNorm affine params)
    Returns:
        y:      [batch, out_channels, out_frames] float32
        length: [batch] or None
    """
    B, C_in, T_in = x.shape
    C_out = weight.shape[0]
    K, S = kernel_size, stride
    T_out = (T_in - K) // S + 1
    CK = C_in * K

    # Time-major input; MXU operand in bf16 (transpose of the raw input only,
    # never of the K-expanded tensor).
    x_t = jnp.transpose(x, (0, 2, 1)).astype(jnp.bfloat16)          # [B, T_in, C_in]

    # im2col directly in the final (T_out, K*C_in) layout.
    if S == K:
        # Non-overlapping windows: pure reshape, no gather / no extra copy.
        patches = x_t[:, : T_out * K, :].reshape(B, T_out, CK)
    else:
        span = (T_out - 1) * S + 1
        patches = jnp.concatenate(
            [x_t[:, k : k + span : S, :] for k in range(K)], axis=-1
        )                                                            # [B, T_out, K*C_in]

    # Weight reordered (free, it is tiny) to match the patch layout:
    # row index = k * C_in + c_in.  Pad out-channels to a lane multiple.
    C_out_p = _round_up(C_out, 128)
    w2 = jnp.transpose(weight, (2, 1, 0)).reshape(CK, C_out).astype(jnp.bfloat16)
    if C_out_p != C_out:
        w2 = jnp.pad(w2, ((0, 0), (0, C_out_p - C_out)))

    def _pad_vec(v):
        v = v.reshape(1, C_out).astype(jnp.float32)
        if C_out_p != C_out:
            v = jnp.pad(v, ((0, 0), (0, C_out_p - C_out)))
        return v

    b2, g2, bt2 = _pad_vec(bias), _pad_vec(ln_gamma), _pad_vec(ln_beta)

    # Time tiling: large tiles (up to 1024 rows), multiple of 128 so the
    # transposed store is lane dense; fits comfortably in VMEM everywhere.
    TM = min(1024, _round_up(T_out, 128))
    T_out_p = _round_up(T_out, TM)
    if T_out_p != T_out:
        patches = jnp.pad(patches, ((0, 0), (0, T_out_p - T_out), (0, 0)))

    kernel = functools.partial(_conv_block_kernel, n_valid_ch=C_out)

    out = pl.pallas_call(
        kernel,
        out_shape=jax.ShapeDtypeStruct((B, C_out_p, T_out_p), jnp.float32),
        grid_spec=pltpu.PrefetchScalarGridSpec(
            num_scalar_prefetch=0,
            grid=(B, T_out_p // TM),
            in_specs=[
                pl.BlockSpec((1, TM, CK), lambda b, t: (b, t, 0)),
                pl.BlockSpec((CK, C_out_p), lambda b, t: (0, 0)),    # constant: fetched once
                pl.BlockSpec((1, C_out_p), lambda b, t: (0, 0)),
                pl.BlockSpec((1, C_out_p), lambda b, t: (0, 0)),
                pl.BlockSpec((1, C_out_p), lambda b, t: (0, 0)),
            ],
            out_specs=pl.BlockSpec((1, C_out_p, TM), lambda b, t: (b, 0, t)),
        ),
        compiler_params=pltpu.CompilerParams(
            dimension_semantics=("parallel", "parallel"),
            vmem_limit_bytes=48 * 1024 * 1024,   # headroom even on v7x's 64 MiB VMEM
        ),
    )(patches, w2, b2, g2, bt2)

    y = out[:, :C_out, :T_out]                                       # [B, C_out, T_out]

    if length is not None:
        length = (length - K) // S + 1
        length = jnp.maximum(jnp.zeros_like(length), length)
    return y, length


def _reference(x, weight, bias, ln_gamma, ln_beta, K, S):
    """Pure-JAX f32 reference (conv -> channel LayerNorm -> exact GELU)."""
    y = lax.conv_general_dilated(
        x, weight, window_strides=(S,), padding="VALID",
        dimension_numbers=("NCH", "OIH", "NCH"),
    )
    y = y + bias[None, :, None]
    mean = jnp.mean(y, axis=1, keepdims=True)
    var = jnp.mean(jnp.square(y - mean), axis=1, keepdims=True)
    y = (y - mean) * lax.rsqrt(var + 1e-5)
    y = y * ln_gamma[None, :, None] + ln_beta[None, :, None]
    return 0.5 * y * (1.0 + lax.erf(y / jnp.sqrt(2.0)))


if __name__ == "__main__":
    key = jax.random.PRNGKey(0)
    k1, k2, k3, k4, k5 = jax.random.split(key, 5)

    # Small shapes consistent with the module's forward (stride < kernel_size
    # exercises the overlapping-window im2col path).
    B, C_in, T_in = 2, 4, 32
    C_out, K, S = 32, 4, 2

    x = jax.random.normal(k1, (B, C_in, T_in), dtype=jnp.float32)
    length = jnp.array([32, 20], dtype=jnp.int32)

    weight = jax.random.normal(k2, (C_out, C_in, K), dtype=jnp.float32) * 0.1
    bias = jax.random.normal(k3, (C_out,), dtype=jnp.float32) * 0.1
    ln_gamma = 1.0 + 0.1 * jax.random.normal(k4, (C_out,), dtype=jnp.float32)
    ln_beta = 0.1 * jax.random.normal(k5, (C_out,), dtype=jnp.float32)

    y, new_len = conv_layer_block(
        x, length, weight, bias, ln_gamma, ln_beta, kernel_size=K, stride=S
    )
    jax.block_until_ready(y)
    jax.block_until_ready(new_len)

    T_out = (T_in - K) // S + 1
    assert y.shape == (B, C_out, T_out), y.shape
    assert new_len.shape == (B,), new_len.shape

    # Numerical sanity check against an f32 reference (bf16 matmul tolerance).
    y_ref = _reference(x, weight, bias, ln_gamma, ln_beta, K, S)
    max_err = float(jnp.max(jnp.abs(y - y_ref)))
    assert max_err < 5e-2, f"max abs error {max_err}"

    # Length rule matches torch.div(..., rounding_mode='floor') + clamp at 0.
    ref_len = jnp.maximum(jnp.zeros_like(length), (length - K) // S + 1)
    assert bool(jnp.all(new_len == ref_len))

    print("KERNEL_OK")
</pallas_src>

<mosaic_0001>
module attributes {stable_mosaic.version = 11 : i64} {
  func.func @_conv_block_kernel(%arg0: i32, %arg1: i32, %arg2: memref<1x128x16xbf16, #tpu.memory_space<vmem>>, %arg3: memref<16x128xbf16, #tpu.memory_space<vmem>>, %arg4: memref<1x128xf32, #tpu.memory_space<vmem>>, %arg5: memref<1x128xf32, #tpu.memory_space<vmem>>, %arg6: memref<1x128xf32, #tpu.memory_space<vmem>>, %arg7: memref<1x128x128xf32, #tpu.memory_space<vmem>>) attributes {dimension_semantics = [#tpu.dimension_semantics<parallel>, #tpu.dimension_semantics<parallel>], iteration_bounds = array<i64: 2, 1>, scalar_prefetch = 0 : i64, scratch_operands = 0 : i64, tpu.core_type = #tpu.core_type<tc>, window_params = [{transform_indices = @transform_0, window_bounds = array<i64: 1, 128, 16>}, {pipeline_mode = #tpu.pipeline_mode<synchronous>, transform_indices = @transform_1, window_bounds = array<i64: 16, 128>}, {pipeline_mode = #tpu.pipeline_mode<synchronous>, transform_indices = @transform_2, window_bounds = array<i64: 1, 128>}, {pipeline_mode = #tpu.pipeline_mode<synchronous>, transform_indices = @transform_3, window_bounds = array<i64: 1, 128>}, {pipeline_mode = #tpu.pipeline_mode<synchronous>, transform_indices = @transform_4, window_bounds = array<i64: 1, 128>}, {transform_indices = @transform_5, window_bounds = array<i64: 1, 128, 128>}]} {
    %c0 = arith.constant 0 : index
    %c0_0 = arith.constant 0 : index
    %c0_1 = arith.constant 0 : index
    %0 = vector.load %arg2[%c0, %c0_0, %c0_1] : memref<1x128x16xbf16, #tpu.memory_space<vmem>>, vector<1x128x16xbf16>
    %1 = vector.shape_cast %0 : vector<1x128x16xbf16> to vector<128x16xbf16>
    %c0_2 = arith.constant 0 : index
    %c0_3 = arith.constant 0 : index
    %2 = vector.load %arg3[%c0_2, %c0_3] : memref<16x128xbf16, #tpu.memory_space<vmem>>, vector<16x128xbf16>
    %cst = arith.constant dense<0.000000e+00> : vector<128x128xf32>
    %3 = tpu.matmul %1, %2, %cst {dimension_numbers = #tpu.dot_dimension_numbers<[1], [0], [0], [1], [0, 0, 1, 1], [], []>} : vector<128x16xbf16>, vector<16x128xbf16>, vector<128x128xf32> -> vector<128x128xf32>
    %c0_4 = arith.constant 0 : index
    %c0_5 = arith.constant 0 : index
    %4 = vector.load %arg4[%c0_4, %c0_5] : memref<1x128xf32, #tpu.memory_space<vmem>>, vector<1x128xf32>
    %5 = vector.broadcast %4 : vector<1x128xf32> to vector<128x128xf32>
    %6 = arith.addf %3, %5 : vector<128x128xf32>
    %7 = tpu.iota {dimensions = array<i32: 1>} : vector<128x128xi32>
    %c32_i32 = arith.constant 32 : i32
    %8 = vector.broadcast %c32_i32 : i32 to vector<128x128xi32>
    %9 = arith.cmpi slt, %7, %8 : vector<128x128xi32>
    %10 = arith.extui %9 : vector<128x128xi1> to vector<128x128xi32>
    %11 = arith.sitofp %10 : vector<128x128xi32> to vector<128x128xf32>
    %12 = arith.mulf %6, %11 : vector<128x128xf32>
    %cst_6 = arith.constant dense<0.000000e+00> : vector<128xf32>
    %13 = vector.multi_reduction <add>, %12, %cst_6 [1] : vector<128x128xf32> to vector<128xf32>
    %14 = vector.shape_cast %13 : vector<128xf32> to vector<128x1xf32>
    %cst_7 = arith.constant 3.125000e-02 : f32
    %15 = vector.broadcast %cst_7 : f32 to vector<128x1xf32>
    %16 = arith.mulf %14, %15 : vector<128x1xf32>
    %17 = vector.broadcast %16 : vector<128x1xf32> to vector<128x128xf32>
    %18 = arith.subf %6, %17 : vector<128x128xf32>
    %19 = arith.mulf %18, %18 : vector<128x128xf32>
    %20 = arith.mulf %19, %11 : vector<128x128xf32>
    %cst_8 = arith.constant dense<0.000000e+00> : vector<128xf32>
    %21 = vector.multi_reduction <add>, %20, %cst_8 [1] : vector<128x128xf32> to vector<128xf32>
    %22 = vector.shape_cast %21 : vector<128xf32> to vector<128x1xf32>
    %cst_9 = arith.constant 3.125000e-02 : f32
    %23 = vector.broadcast %cst_9 : f32 to vector<128x1xf32>
    %24 = arith.mulf %22, %23 : vector<128x1xf32>
    %25 = vector.broadcast %16 : vector<128x1xf32> to vector<128x128xf32>
    %26 = arith.subf %6, %25 : vector<128x128xf32>
    %cst_10 = arith.constant 9.99999974E-6 : f32
    %27 = vector.broadcast %cst_10 : f32 to vector<128x1xf32>
    %28 = arith.addf %24, %27 : vector<128x1xf32>
    %29 = math.rsqrt %28 : vector<128x1xf32>
    %30 = vector.broadcast %29 : vector<128x1xf32> to vector<128x128xf32>
    %31 = arith.mulf %26, %30 : vector<128x128xf32>
    %c0_11 = arith.constant 0 : index
    %c0_12 = arith.constant 0 : index
    %32 = vector.load %arg5[%c0_11, %c0_12] : memref<1x128xf32, #tpu.memory_space<vmem>>, vector<1x128xf32>
    %33 = vector.broadcast %32 : vector<1x128xf32> to vector<128x128xf32>
    %34 = arith.mulf %31, %33 : vector<128x128xf32>
    %c0_13 = arith.constant 0 : index
    %c0_14 = arith.constant 0 : index
    %35 = vector.load %arg6[%c0_13, %c0_14] : memref<1x128xf32, #tpu.memory_space<vmem>>, vector<1x128xf32>
    %36 = vector.broadcast %35 : vector<1x128xf32> to vector<128x128xf32>
    %37 = arith.addf %34, %36 : vector<128x128xf32>
    %cst_15 = arith.constant 5.000000e-01 : f32
    %38 = vector.broadcast %cst_15 : f32 to vector<128x128xf32>
    %39 = arith.mulf %38, %37 : vector<128x128xf32>
    %cst_16 = arith.constant 0.707106769 : f32
    %40 = vector.broadcast %cst_16 : f32 to vector<128x128xf32>
    %41 = arith.mulf %37, %40 : vector<128x128xf32>
    %42 = math.erf %41 : vector<128x128xf32>
    %cst_17 = arith.constant 1.000000e+00 : f32
    %43 = vector.broadcast %cst_17 : f32 to vector<128x128xf32>
    %44 = arith.addf %43, %42 : vector<128x128xf32>
    %45 = arith.mulf %39, %44 : vector<128x128xf32>
    %46 = tpu.transpose %45, [1, 0] : vector<128x128xf32> -> vector<128x128xf32>
    %c0_18 = arith.constant 0 : index
    %c0_19 = arith.constant 0 : index
    %c0_20 = arith.constant 0 : index
    %47 = vector.load %arg7[%c0_18, %c0_19, %c0_20] : memref<1x128x128xf32, #tpu.memory_space<vmem>>, vector<1x128x128xf32>
    %48 = vector.shape_cast %47 : vector<1x128x128xf32> to vector<128x128xf32>
    %49 = vector.shape_cast %46 : vector<128x128xf32> to vector<1x128x128xf32>
    tpu.vector_store %arg7[%c0_18, %c0_19, %c0_20], %49 {strides = array<i32>} : memref<1x128x128xf32, #tpu.memory_space<vmem>>, vector<1x128x128xf32>,
    return
  }
  func.func @transform_0(%arg0: i32, %arg1: i32) -> (i32, i32, i32) {
    %c0_i32 = arith.constant 0 : i32
    %c0_i32_0 = arith.constant 0 : i32
    return %arg0, %arg1, %c0_i32 : i32, i32, i32
  }
  func.func @transform_1(%arg0: i32, %arg1: i32) -> (i32, i32) {
    %c0_i32 = arith.constant 0 : i32
    %c0_i32_0 = arith.constant 0 : i32
    %c0_i32_1 = arith.constant 0 : i32
    return %c0_i32, %c0_i32_0 : i32, i32
  }
  func.func @transform_2(%arg0: i32, %arg1: i32) -> (i32, i32) {
    %c0_i32 = arith.constant 0 : i32
    %c0_i32_0 = arith.constant 0 : i32
    %c0_i32_1 = arith.constant 0 : i32
    return %c0_i32, %c0_i32_0 : i32, i32
  }
  func.func @transform_3(%arg0: i32, %arg1: i32) -> (i32, i32) {
    %c0_i32 = arith.constant 0 : i32
    %c0_i32_0 = arith.constant 0 : i32
    %c0_i32_1 = arith.constant 0 : i32
    return %c0_i32, %c0_i32_0 : i32, i32
  }
  func.func @transform_4(%arg0: i32, %arg1: i32) -> (i32, i32) {
    %c0_i32 = arith.constant 0 : i32
    %c0_i32_0 = arith.constant 0 : i32
    %c0_i32_1 = arith.constant 0 : i32
    return %c0_i32, %c0_i32_0 : i32, i32
  }
  func.func @transform_5(%arg0: i32, %arg1: i32) -> (i32, i32, i32) {
    %c0_i32 = arith.constant 0 : i32
    %c0_i32_0 = arith.constant 0 : i32
    return %arg0, %c0_i32, %arg1 : i32, i32, i32
  }
}

</mosaic_0001>

<bundles_post_ra>
// kernel: conv_layer_block.1
= control target key start
LH: loop header
LB: loop body
LE: loop exit
PB: predicated region body
PF: predicated region fallthrough
CT: control target
= control target key end

     0   :  { %s1141_s18 = smov 0   ;;  %s1143_s19 = smov 0   ;;  %s1458_s0 = inlined_call_operand.vmem [shape: bf16[2,128,16], index: 0, kind: input, shape index: {}]   ;;  %s1459_s1 = inlined_call_operand.vmem [shape: bf16[16,128], index: 1, kind: input, shape index: {}]   ;;  %s1460_s2 = inlined_call_operand.vmem [shape: f32[1,128], index: 2, kind: input, shape index: {}]   ;;  %s1461_s3 = inlined_call_operand.vmem [shape: f32[1,128], index: 3, kind: input, shape index: {}]   ;;  %s1462_s4 = inlined_call_operand.vmem [shape: f32[1,128], index: 4, kind: input, shape index: {}]   ;;  %s1463_s5 = inlined_call_operand.vmem [shape: f32[2,128,128], index: 5, kind: output, shape index: {}]  }
   0x1   :  { %s1145_s20 = smov 0  }
   0x2 LB: > { %s27_s21 = sadd.s32 1, %s1104_s19  ;;  %p929_p0 = scmp.ge.s32.totalorder %s1108_s20, 1  ;;  %s1108_s20 = sphi %s1145_s20, %s15_s20   ;;  %s1104_s19 = sphi %s1143_s19, %s1465_s19   ;;  %s1100_s18 = sphi %s1141_s18, %s1464_s18  }
   0x3   : > { %p29_p1 = scmp.ge.s32.totalorder %s27_s21, 2  ;;  %p208_p2 = scmp.lt.s32.totalorder %s1108_s20, 3 }
   0x5   : > { %s1467_s21 = smov (%p29_p1, %s27_s21), 0  ;;  %p209_p3 = pnand %p929_p0, %p208_p2 }
   0x6   : > { %p244_p4 = scmp.lt.s32.totalorder (!%p209_p3), %s1100_s18, 1 }
   0x7   : > { %212 = sbr.rel (%p209_p3) target bundleno = 730 (0x2da), region = 40 }
   0xc   : > { %v1013_v0 = vld [vmem:[%s1459_s1] sm:$0xff]   ;;  %s1469_s18 = smov (!%p244_p4, %s1100_s18), 1  ;;  %vm333_vm0 = vcmask 130048   ;;  %v455_v9 = vlaneseq  ;;  %v1110_v13 = vmov 0.0  }
   0xd   : > { %968 = vmatprep.subr.bf16.mxu0 %v1013_v0  ;;  %986 = vmatprep.subr.bf16.mxu1 %v1013_v0  ;;  %s957_s24 = sshll.u32 %s1469_s18, 6  ;;  %v934_v11 = vld [vmem:[%s1460_s2] ss:$0 sm:$0xff]  ;;  %s958_s9 = sshll.u32 %s1469_s18, 7 }
   0xe   : > { %969 = vmatpush3.bf16.msra.mxu0 %v1013_v0  ;;  %987 = vmatpush3.bf16.msra.mxu1 %v1013_v0  ;;  %s251_s27 = scalar_lea.vmem %s1458_s0, %s957_s24  ;;  %v456_v10 = vand.u32 127, %v455_v9  ;;  %s1431_s12 = scalar_lea.vmem %s1463_s5, %s958_s9 }
   0xf   : > { %v1014_v1 = vld [vmem:[%s251_s27] sm:$0xff]   ;;  %v1015_v2 = vld [vmem:[%s251_s27 + $0x8] sm:$0xff]   ;;  %v1016_v3 = vld [vmem:[%s251_s27 + $0x10] sm:$0xff]  }
  0x10   : > { %970 = vmatprep.mubr.msk.bf16.mxu0 %vm333_vm0, %v1014_v1  ;;  %v1018_v4 = vld [vmem:[%s251_s27 + $0x20] sm:$0xff]   ;;  %v1019_v5 = vld [vmem:[%s251_s27 + $0x28] sm:$0xff]   ;;  %v1020_v6 = vld [vmem:[%s251_s27 + $0x30] sm:$0xff]   ;;  %vm457_vm1 = vcmp.lt.s32.totalorder %v456_v10, 32 }
  0x11   : > { %971 = vmatmul.mubr.msk.bf16.vlgmr.msra.gmra.mxu0 %vm333_vm0, %v1015_v2  ;;  %978 = vmatprep.mubr.msk.bf16.mxu1 %vm333_vm0, %v1018_v4  ;;  %v1017_v7 = vld [vmem:[%s251_s27 + $0x18] sm:$0xff]   ;;  %v1179_v14 = vsel %vm457_vm1, 1.0, %v1110_v13 }
  0x12   : > { %974 = vmatprep.mubr.msk.bf16.mxu0 %vm333_vm0, %v1016_v3  ;;  %979 = vmatmul.mubr.msk.bf16.vlgmr.msra.gmra.mxu1 %vm333_vm0, %v1019_v5  ;;  %v1021_v8 = vld [vmem:[%s251_s27 + $0x38] sm:$0xff]  }
  0x13   : > { %982 = vmatprep.mubr.msk.bf16.mxu1 %vm333_vm0, %v1020_v6 }
  0x19   : > { %975 = vmatmul.mubr.msk.bf16.gmra.mxu0 %vm333_vm0, %v1017_v7 }
  0x1a   : > { %983 = vmatmul.mubr.msk.bf16.gmra.mxu1 %vm333_vm0, %v1021_v8 }
  0xd1   : > { %v972_v12 = vpop.f32.mrf.mxu0 }
  0xd2   : > { %v1181_v15 = vadd.f32 %v972_v12, %v934_v11  ;;  %v980_v20 = vpop.f32.mrf.mxu1 }
  0xd3   : > { %v392_v16 = vpop.f32.mrf.mxu0  ;;  %v1210_v44 = vadd.f32 %v980_v20, %v934_v11 }
  0xd4   : > { %v1183_v17 = vadd.f32 %v934_v11, %v392_v16  ;;  %v462_v18 = vmul.f32 %v1179_v14, %v1181_v15  ;;  %v424_v24 = vpop.f32.mrf.mxu1 }
  0xd5   : > { %v973_v19 = vpop.f32.mrf.mxu0  ;;  %v1202_v39 = vadd.f32 %v934_v11, %v424_v24  ;;  %v470_v52 = vmul.f32 %v1179_v14, %v1210_v44 }
  0xd6   : > { %v1187_v21 = vadd.f32 %v973_v19, %v934_v11  ;;  %480 = vadd.xlane.f32.xlu1 %v462_v18  ;;  %v460_v22 = vmul.f32 %v1179_v14, %v1183_v17  ;;  %v981_v28 = vpop.f32.mrf.mxu1 }
  0xd7   : > { %v395_v23 = vpop.f32.mrf.mxu0  ;;  %v468_v46 = vmul.f32 %v1179_v14, %v1202_v39  ;;  %v1218_v49 = vadd.f32 %v981_v28, %v934_v11 }
  0xd8   : > { %v1191_v25 = vadd.f32 %v934_v11, %v395_v23  ;;  %476 = vadd.xlane.f32.xlu0 %v460_v22  ;;  %v463_v26 = vmul.f32 %v1179_v14, %v1187_v21  ;;  %v427_v31 = vpop.f32.mrf.mxu1 }
  0xd9   : > { %v976_v27 = vpop.f32.mrf.mxu0  ;;  %v1212_v45 = vadd.f32 %v934_v11, %v427_v31  ;;  %v471_v54 = vmul.f32 %v1179_v14, %v1218_v49 }
  0xda   : > { %482 = vadd.xlane.f32.xlu1 %v463_v26  ;;  %v461_v29 = vmul.f32 %v1179_v14, %v1191_v25  ;;  %v1197_v32 = vadd.f32 %v976_v27, %v934_v11  ;;  %v984_v35 = vpop.f32.mrf.mxu1 }
  0xdb   : > { %v408_v30 = vpop.f32.mrf.mxu0  ;;  %v469_v51 = vmul.f32 %v1179_v14, %v1212_v45  ;;  %v1228_v55 = vadd.f32 %v984_v35, %v934_v11 }
  0xdc   : > { %v409_v33 = vadd.f32 %v934_v11, %v408_v30  ;;  %478 = vadd.xlane.f32.xlu0 %v461_v29  ;;  %v466_v40 = vmul.f32 %v1179_v14, %v1197_v32  ;;  %v440_v41 = vpop.f32.mrf.mxu1 }
  0xdd   : > { %v977_v34 = vpop.f32.mrf.mxu0  ;;  %v1220_v50 = vadd.f32 %v934_v11, %v440_v41  ;;  %v474_v60 = vmul.f32 %v1179_v14, %v1228_v55 }
  0xde   : > { %v464_v36 = vmul.f32 %v1179_v14, %v409_v33  ;;  %v1206_v42 = vadd.f32 %v977_v34, %v934_v11  ;;  %v985_v47 = vpop.f32.mrf.mxu1 }
  0xdf   : > { %v411_v37 = vpop.f32.mrf.mxu0  ;;  %v472_v57 = vmul.f32 %v1179_v14, %v1220_v50  ;;  %v1234_v58 = vadd.f32 %v985_v47, %v934_v11 }
  0xe0   : > { %v1200_v38 = vadd.f32 %v934_v11, %v411_v37  ;;  %484 = vadd.xlane.f32.xlu0 %v464_v36  ;;  %v467_v48 = vmul.f32 %v1179_v14, %v1206_v42  ;;  %v443_v53 = vpop.f32.mrf.mxu1 }
  0xe1   : > { %v1230_v56 = vadd.f32 %v934_v11, %v443_v53  ;;  %v475_v61 = vmul.f32 %v1179_v14, %v1234_v58 }
  0xe2   : > { %v465_v43 = vmul.f32 %v1179_v14, %v1200_v38 }
  0xe3   : > { %v473_v59 = vmul.f32 %v1179_v14, %v1230_v56 }
  0xe4   : > { %486 = vadd.xlane.f32.xlu1 %v465_v43  ;;  %488 = vadd.xlane.f32.xlu0 %v466_v40 }
  0xe8   : > { %490 = vadd.xlane.f32.xlu1 %v467_v48  ;;  %492 = vadd.xlane.f32.xlu0 %v468_v46 }
  0xec   : > { %494 = vadd.xlane.f32.xlu1 %v469_v51  ;;  %496 = vadd.xlane.f32.xlu0 %v470_v52 }
  0xf0   : > { %498 = vadd.xlane.f32.xlu1 %v471_v54  ;;  %500 = vadd.xlane.f32.xlu0 %v472_v57 }
  0xf4   : > { %502 = vadd.xlane.f32.xlu1 %v473_v59  ;;  %504 = vadd.xlane.f32.xlu0 %v474_v60 }
  0xf8   : > { %506 = vadd.xlane.f32.xlu1 %v475_v61 }
 0x15f   : > { %v481_v62 = vpop.xlane.xlu1 %480 }
 0x160   : > { %v510_v63 = vmul.f32 0.03125, %v481_v62 }
 0x161   : > { %v477_v0 = vpop.xlane.xlu0 %476 }
 0x162   : > { %v508_v1 = vmul.f32 0.03125, %v477_v0  ;;  %v1243_v3 = vsub.f32 %v1181_v15, %v510_v63 }
 0x163   : > { %v483_v2 = vpop.xlane.xlu1 %482 }
 0x164   : > { %v1246_v4 = vsub.f32 %v1183_v17, %v508_v1  ;;  %v511_v5 = vmul.f32 0.03125, %v483_v2  ;;  %v542_v12 = vmul.f32 %v1243_v3, %v1243_v3 }
 0x165   : > { %v479_v6 = vpop.xlane.xlu0 %478 }
 0x166   : > { %v509_v7 = vmul.f32 0.03125, %v479_v6  ;;  %v540_v8 = vmul.f32 %v1246_v4, %v1246_v4  ;;  %v1251_v9 = vsub.f32 %v1187_v21, %v511_v5  ;;  %v558_v18 = vmul.f32 %v1179_v14, %v542_v12 }
 0x168   : > { %v1254_v10 = vsub.f32 %v1191_v25, %v509_v7  ;;  %v556_v11 = vmul.f32 %v1179_v14, %v540_v8  ;;  %v543_v20 = vmul.f32 %v1251_v9, %v1251_v9 }
 0x169   : > { %v485_v13 = vpop.xlane.xlu0 %484 }
 0x16a   : > { %v512_v15 = vmul.f32 0.03125, %v485_v13  ;;  %572 = vadd.xlane.f32.xlu0 %v556_v11  ;;  %v541_v16 = vmul.f32 %v1254_v10, %v1254_v10  ;;  %v559_v28 = vmul.f32 %v1179_v14, %v543_v20 }
 0x16c   : > { %v1261_v17 = vsub.f32 %v409_v33, %v512_v15  ;;  %v557_v19 = vmul.f32 %v1179_v14, %v541_v16 }
 0x16d   : > { %v487_v21 = vpop.xlane.xlu1 %486  ;;  %v489_v22 = vpop.xlane.xlu0 %488 }
 0x16e   : > { %v513_v23 = vmul.f32 0.03125, %v487_v21  ;;  %v514_v24 = vmul.f32 0.03125, %v489_v22  ;;  %576 = vadd.xlane.f32.xlu0 %v558_v18  ;;  %574 = vadd.xlane.f32.xlu1 %v557_v19  ;;  %v544_v25 = vmul.f32 %v1261_v17, %v1261_v17 }
 0x170   : > { %v1270_v26 = vsub.f32 %v1200_v38, %v513_v23  ;;  %v1273_v27 = vsub.f32 %v1197_v32, %v514_v24  ;;  %v560_v29 = vmul.f32 %v1179_v14, %v544_v25 }
 0x171   : > { %v491_v30 = vpop.xlane.xlu1 %490  ;;  %v493_v31 = vpop.xlane.xlu0 %492 }
 0x172   : > { %v515_v33 = vmul.f32 0.03125, %v491_v30  ;;  %v516_v34 = vmul.f32 0.03125, %v493_v31  ;;  %578 = vadd.xlane.f32.xlu1 %v559_v28  ;;  %580 = vadd.xlane.f32.xlu0 %v560_v29  ;;  %v545_v35 = vmul.f32 %v1270_v26, %v1270_v26  ;;  %v546_v36 = vmul.f32 %v1273_v27, %v1273_v27 }
 0x174   : > { %v1282_v37 = vsub.f32 %v1206_v42, %v515_v33  ;;  %v1285_v32 = vsub.f32 %v1202_v39, %v516_v34  ;;  %v561_v38 = vmul.f32 %v1179_v14, %v545_v35  ;;  %v562_v40 = vmul.f32 %v1179_v14, %v546_v36 }
 0x175   : > { %v495_v41 = vpop.xlane.xlu1 %494  ;;  %v497_v43 = vpop.xlane.xlu0 %496 }
 0x176   : > { %v517_v46 = vmul.f32 0.03125, %v495_v41  ;;  %v518_v47 = vmul.f32 0.03125, %v497_v43  ;;  %582 = vadd.xlane.f32.xlu1 %v561_v38  ;;  %584 = vadd.xlane.f32.xlu0 %v562_v40  ;;  %v547_v48 = vmul.f32 %v1282_v37, %v1282_v37  ;;  %v548_v42 = vmul.f32 %v1285_v32, %v1285_v32 }
 0x178   : > { %v1294_v51 = vsub.f32 %v1212_v45, %v517_v46  ;;  %v1297_v39 = vsub.f32 %v1210_v44, %v518_v47  ;;  %v563_v52 = vmul.f32 %v1179_v14, %v547_v48  ;;  %v564_v53 = vmul.f32 %v1179_v14, %v548_v42 }
 0x179   : > { %v499_v54 = vpop.xlane.xlu1 %498  ;;  %v501_v57 = vpop.xlane.xlu0 %500 }
 0x17a   : > { %v519_v59 = vmul.f32 0.03125, %v499_v54  ;;  %v520_v60 = vmul.f32 0.03125, %v501_v57  ;;  %586 = vadd.xlane.f32.xlu1 %v563_v52  ;;  %588 = vadd.xlane.f32.xlu0 %v564_v53  ;;  %v549_v61 = vmul.f32 %v1294_v51, %v1294_v51  ;;  %v550_v45 = vmul.f32 %v1297_v39, %v1297_v39 }
 0x17c   : > { %v1306_v62 = vsub.f32 %v1218_v49, %v519_v59  ;;  %v1309_v44 = vsub.f32 %v1220_v50, %v520_v60  ;;  %v565_v63 = vmul.f32 %v1179_v14, %v549_v61  ;;  %v566_v0 = vmul.f32 %v1179_v14, %v550_v45  ;;  %v1340_v59 = vld [vmem:[%s1461_s3] ss:$0 sm:$0xff] }
 0x17d   : > { %v503_v1 = vpop.xlane.xlu1 %502  ;;  %v505_v2 = vpop.xlane.xlu0 %504 }
 0x17e   : > { %v521_v5 = vmul.f32 0.03125, %v503_v1  ;;  %v522_v6 = vmul.f32 0.03125, %v505_v2  ;;  %590 = vadd.xlane.f32.xlu1 %v565_v63  ;;  %592 = vadd.xlane.f32.xlu0 %v566_v0  ;;  %v551_v7 = vmul.f32 %v1306_v62, %v1306_v62  ;;  %v552_v49 = vmul.f32 %v1309_v44, %v1309_v44  ;;  %v1346_v1 = vld [vmem:[%s1462_s4] ss:$0 sm:$0xff] }
 0x180   : > { %v1318_v8 = vsub.f32 %v1230_v56, %v521_v5  ;;  %v1321_v50 = vsub.f32 %v1228_v55, %v522_v6  ;;  %v567_v11 = vmul.f32 %v1179_v14, %v551_v7  ;;  %v568_v12 = vmul.f32 %v1179_v14, %v552_v49 }
 0x181   : > { %v507_v13 = vpop.xlane.xlu1 %506 }
 0x182   : > { %v523_v15 = vmul.f32 0.03125, %v507_v13  ;;  %594 = vadd.xlane.f32.xlu1 %v567_v11  ;;  %596 = vadd.xlane.f32.xlu0 %v568_v12  ;;  %v553_v16 = vmul.f32 %v1318_v8, %v1318_v8  ;;  %v554_v18 = vmul.f32 %v1321_v50, %v1321_v50 }
 0x184   : > { %v1330_v56 = vsub.f32 %v1234_v58, %v523_v15  ;;  %v569_v55 = vmul.f32 %v1179_v14, %v553_v16  ;;  %v570_v19 = vmul.f32 %v1179_v14, %v554_v18 }
 0x186   : > { %598 = vadd.xlane.f32.xlu1 %v569_v55  ;;  %600 = vadd.xlane.f32.xlu0 %v570_v19  ;;  %v555_v20 = vmul.f32 %v1330_v56, %v1330_v56 }
 0x188   : > { %v571_v21 = vmul.f32 %v1179_v14, %v555_v20 }
 0x18a   : > { %602 = vadd.xlane.f32.xlu1 %v571_v21 }
 0x1f3   : > { %v573_v22 = vpop.xlane.xlu0 %572 }
 0x1f4   : > { %v604_v23 = vmul.f32 0.03125, %v573_v22 }
 0x1f6   : > { %v620_v24 = vadd.f32 1e-05, %v604_v23 }
 0x1f7   : > { %v575_v25 = vpop.xlane.xlu1 %574  ;;  %v577_v28 = vpop.xlane.xlu0 %576 }
 0x1f8   : > { %1022 = vrsqrt.f32 %v620_v24  ;;  %v605_v58 = vmul.f32 0.03125, %v575_v25  ;;  %v606_v29 = vmul.f32 0.03125, %v577_v28 }
 0x1fa   : > { %v621_v30 = vadd.f32 1e-05, %v605_v58  ;;  %v622_v31 = vadd.f32 1e-05, %v606_v29 }
 0x1fb   : > { %v579_v33 = vpop.xlane.xlu1 %578  ;;  %v581_v34 = vpop.xlane.xlu0 %580 }
 0x1fc   : > { %1024 = vrsqrt.f32 %v621_v30  ;;  %v607_v35 = vmul.f32 0.03125, %v579_v33  ;;  %v608_v36 = vmul.f32 0.03125, %v581_v34 }
 0x1fd   : > { %1026 = vrsqrt.f32 %v622_v31 }
 0x1fe   : > { %v623_v38 = vadd.f32 1e-05, %v607_v35  ;;  %v624_v40 = vadd.f32 1e-05, %v608_v36 }
 0x1ff   : > { %v583_v14 = vpop.xlane.xlu1 %582  ;;  %v585_v41 = vpop.xlane.xlu0 %584 }
 0x200   : > { %1028 = vrsqrt.f32 %v623_v38  ;;  %v609_v43 = vmul.f32 0.03125, %v583_v14  ;;  %v610_v46 = vmul.f32 0.03125, %v585_v41 }
 0x201   : > { %1030 = vrsqrt.f32 %v624_v40 }
 0x202   : > { %v625_v47 = vadd.f32 1e-05, %v609_v43  ;;  %v626_v48 = vadd.f32 1e-05, %v610_v46 }
 0x203   : > { %v587_v42 = vpop.xlane.xlu1 %586  ;;  %v589_v52 = vpop.xlane.xlu0 %588 }
 0x204   : > { %1032 = vrsqrt.f32 %v625_v47  ;;  %v611_v53 = vmul.f32 0.03125, %v587_v42  ;;  %v612_v54 = vmul.f32 0.03125, %v589_v52 }
 0x205   : > { %v1023_v57 = vpop.eup %1022  ;;  %1034 = vrsqrt.f32 %v626_v48 }
 0x206   : > { %v627_v60 = vadd.f32 1e-05, %v611_v53  ;;  %v652_v61 = vmul.f32 %v1023_v57, %v1246_v4  ;;  %v628_v45 = vadd.f32 1e-05, %v612_v54 }
 0x207   : > { %v591_v63 = vpop.xlane.xlu1 %590  ;;  %v593_v0 = vpop.xlane.xlu0 %592 }
 0x208   : > { %1036 = vrsqrt.f32 %v627_v60  ;;  %v613_v2 = vmul.f32 0.03125, %v591_v63  ;;  %v675_v5 = vmul.f32 %v1340_v59, %v652_v61  ;;  %v614_v11 = vmul.f32 0.03125, %v593_v0 }
 0x209   : > { %v1025_v6 = vpop.eup %1024  ;;  %1038 = vrsqrt.f32 %v628_v45 }
 0x20a   : > { %v1027_v7 = vpop.eup %1026  ;;  %v629_v49 = vadd.f32 1e-05, %v613_v2  ;;  %v698_v12 = vadd.f32 %v1346_v1, %v675_v5  ;;  %v653_v4 = vmul.f32 %v1025_v6, %v1254_v10  ;;  %v630_v22 = vadd.f32 1e-05, %v614_v11 }
 0x20b   : > { %v595_v13 = vpop.xlane.xlu1 %594  ;;  %v654_v15 = vmul.f32 %v1027_v7, %v1243_v3  ;;  %v597_v23 = vpop.xlane.xlu0 %596 }
 0x20c   : > { %v615_v18 = vmul.f32 0.03125, %v595_v13  ;;  %v730_v55 = vmul.f32 0.70710677, %v698_v12  ;;  %v676_v19 = vmul.f32 %v1340_v59, %v653_v4  ;;  %1040 = vrsqrt.f32 %v629_v49 }
 0x20d   : > { %v1029_v16 = vpop.eup %1028  ;;  %v677_v20 = vmul.f32 %v1340_v59, %v654_v15  ;;  %v616_v30 = vmul.f32 0.03125, %v597_v23  ;;  %v714_v6 = vmul.f32 0.5, %v698_v12 }
 0x20e   : > { %v1031_v21 = vpop.eup %1030  ;;  %v655_v24 = vmul.f32 %v1029_v16, %v1251_v9  ;;  %1042 = verf.f32 %v730_v55  ;;  %v699_v10 = vadd.f32 %v1346_v1, %v676_v19  ;;  %v631_v29 = vadd.f32 1e-05, %v615_v18 }
 0x20f   : > { %v1357_v25 = vadd.f32 %v1346_v1, %v677_v20  ;;  %v656_v3 = vmul.f32 %v1031_v21, %v1261_v17  ;;  %1044 = vrsqrt.f32 %v630_v22  ;;  %v599_v35 = vpop.xlane.xlu1 %598  ;;  %v632_v41 = vadd.f32 1e-05, %v616_v30  ;;  %v601_v48 = vpop.xlane.xlu0 %600 }
 0x210   : > { %v678_v28 = vmul.f32 %v1340_v59, %v655_v24  ;;  %v731_v31 = vmul.f32 0.70710677, %v699_v10  ;;  %v617_v47 = vmul.f32 0.03125, %v599_v35  ;;  %v618_v54 = vmul.f32 0.03125, %v601_v48 }
 0x211   : > { %v1033_v58 = vpop.eup %1032  ;;  %v732_v34 = vmul.f32 0.70710677, %v1357_v25  ;;  %v679_v36 = vmul.f32 %v1340_v59, %v656_v3  ;;  %v715_v19 = vmul.f32 0.5, %v699_v10  ;;  %v716_v10 = vmul.f32 0.5, %v1357_v25 }
 0x212   : > { %v1035_v33 = vpop.eup %1034  ;;  %v1363_v9 = vadd.f32 %v1346_v1, %v678_v28  ;;  %1046 = verf.f32 %v731_v31  ;;  %v657_v38 = vmul.f32 %v1033_v58, %v1270_v26  ;;  %v633_v57 = vadd.f32 1e-05, %v617_v47 }
 0x213   : > { %v658_v17 = vmul.f32 %v1035_v33, %v1273_v27  ;;  %1048 = vrsqrt.f32 %v631_v29  ;;  %v1370_v43 = vadd.f32 %v1346_v1, %v679_v36  ;;  %v603_v60 = vpop.xlane.xlu1 %602  ;;  %v634_v49 = vadd.f32 1e-05, %v618_v54 }
 0x214   : > { %v733_v40 = vmul.f32 0.70710677, %v1363_v9  ;;  %v680_v46 = vmul.f32 %v1340_v59, %v657_v38  ;;  %1050 = verf.f32 %v732_v34  ;;  %v619_v5 = vmul.f32 0.03125, %v603_v60 }
 0x215   : > { %v1037_v14 = vpop.eup %1036  ;;  %v681_v42 = vmul.f32 %v1340_v59, %v658_v17  ;;  %v734_v26 = vmul.f32 0.70710677, %v1370_v43  ;;  %v717_v38 = vmul.f32 0.5, %v1363_v9  ;;  %v718_v48 = vmul.f32 0.5, %v1370_v43 }
 0x216   : > { %v659_v52 = vmul.f32 %v1037_v14, %v1282_v37  ;;  %1052 = verf.f32 %v733_v40  ;;  %v1377_v27 = vadd.f32 %v1346_v1, %v680_v46  ;;  %v1039_v53 = vpop.eup %1038 }
 0x217   : > { %1054 = vrsqrt.f32 %v632_v41  ;;  %v1380_v61 = vadd.f32 %v1346_v1, %v681_v42  ;;  %v660_v0 = vmul.f32 %v1039_v53, %v1285_v32  ;;  %v635_v32 = vadd.f32 1e-05, %v619_v5 }
 0x218   : > { %v682_v45 = vmul.f32 %v1340_v59, %v659_v52  ;;  %1056 = verf.f32 %v734_v26  ;;  %v735_v37 = vmul.f32 0.70710677, %v1377_v27  ;;  %v719_v60 = vmul.f32 0.5, %v1377_v27 }
 0x219   : > { %v1041_v63 = vpop.eup %1040  ;;  %1058 = vrsqrt.f32 %v633_v57  ;;  %v736_v11 = vmul.f32 0.70710677, %v1380_v61  ;;  %v683_v16 = vmul.f32 %v1340_v59, %v660_v0 }
 0x21a   : > { %v1387_v4 = vadd.f32 %v1346_v1, %v682_v45  ;;  %1060 = verf.f32 %v735_v37  ;;  %v661_v18 = vmul.f32 %v1041_v63, %v1294_v51 }
 0x21b   : > { %v1043_v2 = vpop.eup %1042  ;;  %1062 = vrsqrt.f32 %v634_v49  ;;  %v1394_v3 = vadd.f32 %v1346_v1, %v683_v16 }
 0x21c   : > { %v762_v7 = vadd.f32 1.0, %v1043_v2  ;;  %v1045_v13 = vpop.eup %1044  ;;  %v737_v21 = vmul.f32 0.70710677, %v1387_v4  ;;  %1064 = verf.f32 %v736_v11  ;;  %v684_v28 = vmul.f32 %v1340_v59, %v661_v18 }
 0x21d   : > { %v662_v22 = vmul.f32 %v1045_v13, %v1297_v39  ;;  %1066 = vrsqrt.f32 %v635_v32  ;;  %v738_v34 = vmul.f32 0.70710677, %v1394_v3  ;;  %v721_v16 = vmul.f32 0.5, %v1387_v4 }
 0x21e   : > { %v778_v15 = vmul.f32 %v762_v7, %v714_v6  ;;  %1068 = verf.f32 %v737_v21  ;;  %v707_v35 = vadd.f32 %v1346_v1, %v684_v28  ;;  %v720_v7 = vmul.f32 0.5, %v1380_v61 }
 0x21f   : > { %v1047_v55 = vpop.eup %1046  ;;  %v685_v29 = vmul.f32 %v1340_v59, %v662_v22  ;;  %1070 = verf.f32 %v738_v34 }
 0x220   : > { %794 = vxpose.xlu0.b32.start [1/16] %v778_v15, 128  ;;  %v763_v12 = vadd.f32 1.0, %v1047_v55  ;;  %v1049_v20 = vpop.eup %1048  ;;  %v739_v46 = vmul.f32 0.70710677, %v707_v35  ;;  %v723_v4 = vmul.f32 0.5, %v707_v35 }
 0x221   : > { %v1051_v23 = vpop.eup %1050  ;;  %v663_v30 = vmul.f32 %v1049_v20, %v1306_v62  ;;  %v1404_v17 = vadd.f32 %v1346_v1, %v685_v29 }
 0x222   : > { %v779_v24 = vmul.f32 %v763_v12, %v715_v19  ;;  %v764_v58 = vadd.f32 1.0, %v1051_v23  ;;  %1072 = verf.f32 %v739_v46 }
 0x223   : > { %v1053_v51 = vpop.eup %1052  ;;  %v686_v25 = vmul.f32 %v1340_v59, %v663_v30  ;;  %v740_v42 = vmul.f32 0.70710677, %v1404_v17 }
 0x224   : > { %795 = vxpose.xlu0.b32.cont [2/16] %v779_v24, 128  ;;  %v1055_v39 = vpop.eup %1054  ;;  %v780_v31 = vmul.f32 %v764_v58, %v716_v10  ;;  %v765_v33 = vadd.f32 1.0, %v1053_v51  ;;  %v724_v10 = vmul.f32 0.5, %v1404_v17 }
 0x225   : > { %v1057_v36 = vpop.eup %1056  ;;  %v664_v40 = vmul.f32 %v1055_v39, %v1309_v44  ;;  %v709_v9 = vadd.f32 %v1346_v1, %v686_v25  ;;  %1074 = verf.f32 %v740_v42 }
 0x226   : > { %v1059_v14 = vpop.eup %1058  ;;  %v781_v62 = vmul.f32 %v765_v33, %v717_v38  ;;  %v766_v41 = vadd.f32 1.0, %v1057_v36 }
 0x227   : > { %v1061_v47 = vpop.eup %1060  ;;  %v687_v52 = vmul.f32 %v1340_v59, %v664_v40  ;;  %v665_v44 = vmul.f32 %v1059_v14, %v1318_v8  ;;  %v741_v63 = vmul.f32 0.70710677, %v709_v9  ;;  %v725_v39 = vmul.f32 0.5, %v709_v9 }
 0x228   : > { %796 = vxpose.xlu0.b32.cont [3/16] %v780_v31, 128  ;;  %v1063_v26 = vpop.eup %1062  ;;  %v782_v53 = vmul.f32 %v766_v41, %v718_v48  ;;  %v767_v54 = vadd.f32 1.0, %v1061_v47 }
 0x229   : > { %v1065_v57 = vpop.eup %1064  ;;  %v666_v43 = vmul.f32 %v1063_v26, %v1321_v50  ;;  %v710_v5 = vadd.f32 %v1346_v1, %v687_v52  ;;  %v688_v6 = vmul.f32 %v1340_v59, %v665_v44  ;;  %1076 = verf.f32 %v741_v63 }
 0x22a   : > { %v1067_v45 = vpop.eup %1066  ;;  %v783_v0 = vmul.f32 %v767_v54, %v719_v60  ;;  %v768_v2 = vadd.f32 1.0, %v1065_v57 }
 0x22b   : > { %v1069_v37 = vpop.eup %1068  ;;  %v689_v8 = vmul.f32 %v1340_v59, %v666_v43  ;;  %v667_v27 = vmul.f32 %v1067_v45, %v1330_v56  ;;  %v742_v13 = vmul.f32 0.70710677, %v710_v5  ;;  %v711_v50 = vadd.f32 %v1346_v1, %v688_v6 }
 0x22c   : > { %797 = vxpose.xlu0.b32.cont [4/16] %v781_v62, 128  ;;  %v784_v49 = vmul.f32 %v768_v2, %v720_v7  ;;  %v769_v11 = vadd.f32 1.0, %v1069_v37  ;;  %v1071_v15 = vpop.eup %1070  ;;  %v722_v56 = vmul.f32 0.5, %v1394_v3 }
 0x22d   : > { %v712_v18 = vadd.f32 %v1346_v1, %v689_v8  ;;  %v690_v55 = vmul.f32 %v1340_v59, %v667_v27  ;;  %v770_v61 = vadd.f32 1.0, %v1071_v15  ;;  %1078 = verf.f32 %v742_v13 }
 0x22e   : > { %v785_v32 = vmul.f32 %v769_v11, %v721_v16  ;;  %v743_v19 = vmul.f32 0.70710677, %v711_v50  ;;  %v727_v25 = vmul.f32 0.5, %v711_v50 }
 0x22f   : > { %v1073_v12 = vpop.eup %1072  ;;  %v744_v20 = vmul.f32 0.70710677, %v712_v18  ;;  %v786_v22 = vmul.f32 %v770_v61, %v722_v56  ;;  %v713_v24 = vadd.f32 %v1346_v1, %v690_v55  ;;  %v726_v1 = vmul.f32 0.5, %v710_v5 }
 0x230   : > { %798 = vxpose.xlu0.b32.cont [5/16] %v782_v53, 128  ;;  %v771_v23 = vadd.f32 1.0, %v1073_v12  ;;  %1080 = verf.f32 %v743_v19  ;;  %v728_v62 = vmul.f32 0.5, %v712_v18 }
 0x231   : > { %1082 = verf.f32 %v744_v20  ;;  %v745_v58 = vmul.f32 0.70710677, %v713_v24  ;;  %v729_v47 = vmul.f32 0.5, %v713_v24 }
 0x232   : > { %v1075_v21 = vpop.eup %1074  ;;  %v787_v51 = vmul.f32 %v771_v23, %v723_v4 }
 0x233   : > { %v772_v59 = vadd.f32 1.0, %v1075_v21  ;;  %1084 = verf.f32 %v745_v58 }
 0x234   : > { %799 = vxpose.xlu0.b32.cont [6/16] %v783_v0, 128 }
 0x235   : > { %v788_v29 = vmul.f32 %v772_v59, %v724_v10 }
 0x236   : > { %v1077_v28 = vpop.eup %1076 }
 0x237   : > { %v773_v30 = vadd.f32 1.0, %v1077_v28 }
 0x238   : > { %800 = vxpose.xlu0.b32.cont [7/16] %v784_v49, 128 }
 0x239   : > { %v789_v31 = vmul.f32 %v773_v30, %v725_v39 }
 0x23a   : > { %v1079_v3 = vpop.eup %1078 }
 0x23b   : > { %v774_v33 = vadd.f32 1.0, %v1079_v3 }
 0x23c   : > { %801 = vxpose.xlu0.b32.cont [8/16] %v785_v32, 128 }
 0x23d   : > { %v1081_v34 = vpop.eup %1080  ;;  %v790_v35 = vmul.f32 %v774_v33, %v726_v1 }
 0x23e   : > { %v775_v36 = vadd.f32 1.0, %v1081_v34  ;;  %v1083_v38 = vpop.eup %1082 }
 0x23f   : > { %v776_v14 = vadd.f32 1.0, %v1083_v38 }
 0x240   : > { %802 = vxpose.xlu0.b32.cont [9/16] %v786_v22, 128  ;;  %v791_v40 = vmul.f32 %v775_v36, %v727_v25  ;;  %v1085_v17 = vpop.eup %1084 }
 0x241   : > { %v792_v41 = vmul.f32 %v776_v14, %v728_v62  ;;  %v777_v46 = vadd.f32 1.0, %v1085_v17 }
 0x243   : > { %v793_v48 = vmul.f32 %v777_v46, %v729_v47 }
 0x244   : > { %803 = vxpose.xlu0.b32.cont [10/16] %v787_v51, 128 }
 0x248   : > { %804 = vxpose.xlu0.b32.cont [11/16] %v788_v29, 128 }
 0x24c   : > { %805 = vxpose.xlu0.b32.cont [12/16] %v789_v31, 128 }
 0x250   : > { %806 = vxpose.xlu0.b32.cont [13/16] %v790_v35, 128 }
 0x254   : > { %807 = vxpose.xlu0.b32.cont [14/16] %v791_v40, 128 }
 0x258   : > { %808 = vxpose.xlu0.b32.cont [15/16] %v792_v41, 128 }
 0x25c   : > { %809 = vxpose.xlu0.b32.end [16/16] %v793_v48, 128 }
 0x29c   : > { %v810_v42 = vpop.trf.xlu0 }
 0x29d   : > { %826 = vst [vmem:[%s1431_s12] sm:$0xff] %v810_v42 }
 0x2a0   : > { %v811_v9 = vpop.trf.xlu0 }
 0x2a1   : > { %827 = vst [vmem:[%s1431_s12 + $0x8] sm:$0xff] %v811_v9 }
 0x2a4   : > { %v812_v52 = vpop.trf.xlu0 }
 0x2a5   : > { %828 = vst [vmem:[%s1431_s12 + $0x10] sm:$0xff] %v812_v52 }
 0x2a8   : > { %v813_v26 = vpop.trf.xlu0 }
 0x2a9   : > { %829 = vst [vmem:[%s1431_s12 + $0x18] sm:$0xff] %v813_v26 }
 0x2ac   : > { %v814_v53 = vpop.trf.xlu0 }
 0x2ad   : > { %830 = vst [vmem:[%s1431_s12 + $0x20] sm:$0xff] %v814_v53 }
 0x2b0   : > { %v815_v54 = vpop.trf.xlu0 }
 0x2b1   : > { %831 = vst [vmem:[%s1431_s12 + $0x28] sm:$0xff] %v815_v54 }
 0x2b4   : > { %v816_v44 = vpop.trf.xlu0 }
 0x2b5   : > { %832 = vst [vmem:[%s1431_s12 + $0x30] sm:$0xff] %v816_v44 }
 0x2b8   : > { %v817_v57 = vpop.trf.xlu0 }
 0x2b9   : > { %833 = vst [vmem:[%s1431_s12 + $0x38] sm:$0xff] %v817_v57 }
 0x2bc   : > { %v818_v60 = vpop.trf.xlu0 }
 0x2bd   : > { %834 = vst [vmem:[%s1431_s12 + $0x40] sm:$0xff] %v818_v60 }
 0x2c0   : > { %v819_v45 = vpop.trf.xlu0 }
 0x2c1   : > { %835 = vst [vmem:[%s1431_s12 + $0x48] sm:$0xff] %v819_v45 }
 0x2c4   : > { %v820_v63 = vpop.trf.xlu0 }
 0x2c5   : > { %836 = vst [vmem:[%s1431_s12 + $0x50] sm:$0xff] %v820_v63 }
 0x2c8   : > { %v821_v43 = vpop.trf.xlu0 }
 0x2c9   : > { %837 = vst [vmem:[%s1431_s12 + $0x58] sm:$0xff] %v821_v43 }
 0x2cc   : > { %v822_v37 = vpop.trf.xlu0 }
 0x2cd   : > { %838 = vst [vmem:[%s1431_s12 + $0x60] sm:$0xff] %v822_v37 }
 0x2d0   : > { %v823_v0 = vpop.trf.xlu0 }
 0x2d1   : > { %839 = vst [vmem:[%s1431_s12 + $0x68] sm:$0xff] %v823_v0 }
 0x2d4   : > { %v824_v2 = vpop.trf.xlu0 }
 0x2d5   : > { %840 = vst [vmem:[%s1431_s12 + $0x70] sm:$0xff] %v824_v2 }
 0x2d8   : > { %v825_v5 = vpop.trf.xlu0 }
 0x2d9   : > { %841 = vst [vmem:[%s1431_s12 + $0x78] sm:$0xff] %v825_v5 }
 0x2da PF: > { %s15_s20 = sadd.s32 1, %s1108_s20   ;;  %s1464_s18 = smov %s1104_s19 }
 0x2db   : > { %p12_p5 = scmp.ge.s32.totalorder %s15_s20, 4   ;;  %s1465_s19 = smov %s1467_s21 }
 0x2dd   :  { %14 = sbr.rel (!%p12_p5) target bundleno = 2 (0x2), region = 70 }

</bundles_post_ra>
